<compile_context>
chip_gen: v7x
topology: tpu7x:2x2x1
jax: 0.10.0
libtpu: 0.0.40
codegen_flags: <defaults>
</compile_context>

<pallas_src>
import math

import jax
import jax.numpy as jnp
from jax.experimental import pallas as pl
from jax.experimental.pallas import tpu as pltpu


def _build_pe_table(d_model: int, max_len: int) -> jnp.ndarray:
    """Sinusoidal table identical to the torch buffer pe[:, 0, :] -> (max_len, d_model)."""
    position = jnp.arange(max_len, dtype=jnp.float32)[:, None]                 # (max_len, 1)
    div_term = jnp.exp(
        jnp.arange(0, d_model, 2, dtype=jnp.float32) * (-math.log(10000.0) / d_model)
    )                                                                           # (d_model/2,)
    angles = position * div_term                                                # (max_len, d/2)
    pe = jnp.zeros((max_len, d_model), dtype=jnp.float32)
    pe = pe.at[:, 0::2].set(jnp.sin(angles))
    pe = pe.at[:, 1::2].set(jnp.cos(angles))
    return pe


def _tpu_params():
    """(per-core VMEM tile budget, vmem_limit ceiling, #TensorCores) per chip generation."""
    try:
        kind = jax.devices()[0].device_kind.lower()
    except Exception:
        kind = ""
    if "v5" in kind:                      # v5e: 1 TC, 128 MiB VMEM
        return 40 << 20, 100 << 20, 1
    if "v6" in kind:                      # v6e: 1 TC, 128 MiB VMEM -> prefer big tiles
        return 48 << 20, 100 << 20, 1
    # v7x (and unknown, conservative): 2 TCs, 64 MiB VMEM per TC.
    return 24 << 20, 56 << 20, 2


def _add_pe_flat_kernel(x_ref, pe_ref, o_ref):
    # Lane-dense path: x_ref/o_ref: (B, tf)   pe_ref: (1, tf)   (tf spans flattened seq*d_model)
    o_ref[...] = x_ref[...] + pe_ref[...]


def _add_pe_3d_kernel(x_ref, pe_ref, o_ref):
    # d_model >= 128 path: x_ref/o_ref: (B, ts, D)   pe_ref: (ts, D)
    o_ref[...] = x_ref[...] + pe_ref[...][None, :, :]
    # TODO(synk): nn.Dropout(p=0.3) is training-only; eval-mode forward is identity.


def positional_encoding(x, pe_table, *, vmem_budget_bytes=None):
    """x: (B, S, D); pe_table: (max_len, D) f32.  Returns x + pe[:S] (eval-mode dropout)."""
    B, S, D = x.shape
    assert pe_table.shape[0] >= S, "seq_len exceeds max_len of the PE table"

    budget, ceiling, num_tc = _tpu_params()
    if vmem_budget_bytes is not None:
        budget = vmem_budget_bytes
    budget = min(budget, ceiling - (8 << 20))          # leave double-buffer / scratch headroom

    itemsize = jnp.dtype(x.dtype).itemsize
    # Keep PE in x.dtype: shrinks its HBM stream and vreg pressure; the add runs in the
    # input dtype (bf16-native VALUs on v6e/v7x; compiler upcasts on v5e if needed).
    # TODO(synk): torch would promote bf16 x to f32 output via the f32 pe buffer; we keep
    # x.dtype (identical semantics for the shipped f32 case).
    pe_s = pe_table[:S].astype(x.dtype)                # (S, D)

    total_bytes = (2 * B * S * D + S * D) * itemsize   # x in + y out + pe in
    tiny = total_bytes <= (1 << 20)                    # per-step overhead dominates below ~1 MiB

    if D < 128:
        # ---- Lane-dense flattened path: view (S, D) as a single flat axis of length S*D ----
        N = S * D
        x2 = x.reshape(B, N)
        pe2 = pe_s.reshape(1, N)

        if tiny or N <= 128:
            tf = N                                     # single block, full extent (always legal)
        else:
            per_col = 2 * (2 * B + 1) * itemsize       # double-buffered x,y,pe bytes per flat col
            tf = max(128, (budget // per_col) // 128 * 128)
            if num_tc > 1 and N >= 256:
                # Give the v7x megacore at least two grid steps.
                tf = min(tf, max(128, pl.cdiv(N, 2 * 128) * 128))
            if tf >= N:
                tf = N
            else:
                tf = max(128, (tf // 128) * 128)       # blocked last dim must be /128

        grid = (pl.cdiv(N, tf),)
        actual = 2 * (2 * B + 1) * tf * itemsize
        vmem_limit = int(min(ceiling, max(actual + (4 << 20), 8 << 20)))

        out = pl.pallas_call(
            _add_pe_flat_kernel,
            out_shape=jax.ShapeDtypeStruct((B, N), x.dtype),
            grid_spec=pl.GridSpec(
                grid=grid,
                in_specs=[
                    pl.BlockSpec((B, tf), lambda j: (0, j)),   # x tile (lane-dense)
                    pl.BlockSpec((1, tf), lambda j: (0, j)),   # pe tile (broadcast over batch)
                ],
                out_specs=pl.BlockSpec((B, tf), lambda j: (0, j)),
            ),
            compiler_params=pltpu.CompilerParams(
                dimension_semantics=("parallel",),
                vmem_limit_bytes=vmem_limit,
            ),
        )(x2, pe2)
        return out.reshape(B, S, D)

    # ---- d_model >= 128: last dim already lane-dense; tile along the seq axis ----
    if tiny:
        ts = S
    else:
        per_row = 2 * (2 * B + 1) * D * itemsize       # double-buffered x,y,pe bytes per seq row
        ts = max(8, budget // per_row)
        if num_tc > 1 and S >= 16:
            ts = min(ts, pl.cdiv(S, 2))                # >=2 grid steps only where a 2nd core exists
        if ts >= S:
            ts = S
        else:
            q = 16 if itemsize < 4 else 8              # bf16 packs 2 rows/sublane
            ts = max(q, (ts // q) * q)

    grid = (pl.cdiv(S, ts),)
    actual = 2 * (2 * B + 1) * ts * D * itemsize
    vmem_limit = int(min(ceiling, max(actual + (4 << 20), 8 << 20)))

    return pl.pallas_call(
        _add_pe_3d_kernel,
        out_shape=jax.ShapeDtypeStruct((B, S, D), x.dtype),
        grid_spec=pl.GridSpec(
            grid=grid,
            in_specs=[
                pl.BlockSpec((B, ts, D), lambda j: (0, j, 0)),  # x tile
                pl.BlockSpec((ts, D), lambda j: (j, 0)),        # pe tile
            ],
            out_specs=pl.BlockSpec((B, ts, D), lambda j: (0, j, 0)),
        ),
        compiler_params=pltpu.CompilerParams(
            dimension_semantics=("parallel",),
            vmem_limit_bytes=vmem_limit,
        ),
    )(x, pe_s)


def positional_encoding_ref(x, pe_table):
    """Pure-JAX reference of the torch forward (eval mode: dropout = identity)."""
    S = x.shape[1]
    return x + pe_table[:S].astype(x.dtype)[None, :, :]


if __name__ == "__main__":
    key = jax.random.PRNGKey(0)
    MAX_LEN = 100

    # Shipped module shape: batch=2, seq=8, d_model=32  -> lane-dense flattened path.
    B, S, D = 2, 8, 32
    x = jax.random.normal(key, (B, S, D), dtype=jnp.float32)
    pe_table = _build_pe_table(D, MAX_LEN)

    y = jax.block_until_ready(positional_encoding(x, pe_table))
    y_ref = positional_encoding_ref(x, pe_table)
    assert y.shape == (B, S, D)
    assert jnp.allclose(y, y_ref, atol=1e-6, rtol=1e-6), "mismatch vs reference (flat path)"

    # Also exercise the d_model >= 128 (3-D) path with a small shape.
    B2, S2, D2 = 2, 16, 128
    x2 = jax.random.normal(jax.random.PRNGKey(1), (B2, S2, D2), dtype=jnp.float32)
    pe_table2 = _build_pe_table(D2, MAX_LEN)
    y2 = jax.block_until_ready(positional_encoding(x2, pe_table2))
    y2_ref = positional_encoding_ref(x2, pe_table2)
    assert jnp.allclose(y2, y2_ref, atol=1e-6, rtol=1e-6), "mismatch vs reference (3-D path)"

    print("KERNEL_OK")
</pallas_src>

<mosaic_0001>
module attributes {stable_mosaic.version = 11 : i64} {
  func.func @_add_pe_flat_kernel(%arg0: i32, %arg1: memref<2x256xf32, #tpu.memory_space<vmem>>, %arg2: memref<1x256xf32, #tpu.memory_space<vmem>>, %arg3: memref<2x256xf32, #tpu.memory_space<vmem>>) attributes {dimension_semantics = [#tpu.dimension_semantics<parallel>], iteration_bounds = array<i64: 1>, scalar_prefetch = 0 : i64, scratch_operands = 0 : i64, tpu.core_type = #tpu.core_type<tc>, window_params = [{transform_indices = @transform_0, window_bounds = array<i64: 2, 256>}, {transform_indices = @transform_1, window_bounds = array<i64: 1, 256>}, {transform_indices = @transform_2, window_bounds = array<i64: 2, 256>}]} {
    %c0 = arith.constant 0 : index
    %c0_0 = arith.constant 0 : index
    %0 = vector.load %arg1[%c0, %c0_0] : memref<2x256xf32, #tpu.memory_space<vmem>>, vector<2x256xf32>
    %c0_1 = arith.constant 0 : index
    %c0_2 = arith.constant 0 : index
    %1 = vector.load %arg2[%c0_1, %c0_2] : memref<1x256xf32, #tpu.memory_space<vmem>>, vector<1x256xf32>
    %2 = vector.broadcast %1 : vector<1x256xf32> to vector<2x256xf32>
    %3 = arith.addf %0, %2 : vector<2x256xf32>
    %c0_3 = arith.constant 0 : index
    %c0_4 = arith.constant 0 : index
    %4 = vector.load %arg3[%c0_3, %c0_4] : memref<2x256xf32, #tpu.memory_space<vmem>>, vector<2x256xf32>
    tpu.vector_store %arg3[%c0_3, %c0_4], %3 {strides = array<i32>} : memref<2x256xf32, #tpu.memory_space<vmem>>, vector<2x256xf32>,
    return
  }
  func.func @transform_0(%arg0: i32) -> (i32, i32) {
    %c0_i32 = arith.constant 0 : i32
    %c0_i32_0 = arith.constant 0 : i32
    return %c0_i32, %arg0 : i32, i32
  }
  func.func @transform_1(%arg0: i32) -> (i32, i32) {
    %c0_i32 = arith.constant 0 : i32
    %c0_i32_0 = arith.constant 0 : i32
    return %c0_i32, %arg0 : i32, i32
  }
  func.func @transform_2(%arg0: i32) -> (i32, i32) {
    %c0_i32 = arith.constant 0 : i32
    %c0_i32_0 = arith.constant 0 : i32
    return %c0_i32, %arg0 : i32, i32
  }
}

</mosaic_0001>

<bundles_post_ra>
// kernel: tpu_custom_call.1
= control target key start
LH: loop header
LB: loop body
LE: loop exit
PB: predicated region body
PF: predicated region fallthrough
CT: control target
= control target key end

     0   :  { %7 = vsyncpa [#allocation3], 0  ;;  %s157_s0 = inlined_call_operand.hbm [shape: f32[2,256], index: 0, kind: input, shape index: {}]   ;;  %s158_s1 = inlined_call_operand.vmem [shape: f32[1,256], index: 1, kind: input, shape index: {}]   ;;  %s159_s2 = inlined_call_operand.hbm [shape: f32[2,256], index: 2, kind: output, shape index: {}]  }
   0x1   :  { %8 = vsyncpa [#allocation4], 0  ;;  %s112_s9 = smov [#allocation2]   ;;  %s64_s13 = scalar_lea.hbm %s157_s0, 64 }
   0x2   :  { %s15_s10 = sshll.u32 %s112_s9, 4  ;;  %p65_p0 = scmp.ne.s32.totalorder %s157_s0, %s64_s13  ;;  %s16_s10 = int_to_ptr.vmem [resolvable:$true] %s15_s10 }
   0x3   :  { %p68_p1 = scmp.lt.u32.totalorder %s64_s13, %s157_s0 }
   0x5   :  { %p70_p2 = pnand %p68_p1, %p65_p0 }
   0x7   :  { %73 = shalt.err (!%p70_p2)
}
   0x8   :  { %s74_s18 = scalar_lea.vmem %s16_s10, 64  ;;  %p79_p4 = scmp.lt.s32.totalorder %s16_s10, %s16_s10 }
   0x9   :  { %p75_p3 = scmp.ne.s32.totalorder %s16_s10, %s74_s18  ;;  %p80_p5 = scmp.lt.s32.totalorder %s74_s18, %s74_s18 }
   0xb   :  { %p81_p6 = por %p80_p5, %p79_p4 }
   0xd   :  { %p82_p7 = pnand %p81_p6, %p75_p3 }
   0xf   :  { %85 = shalt.err (!%p82_p7)
}
  0x10   :  { %18 = dma.hbm_to_vmem [thread:$0]  %s157_s0, 64, %s16_s10, [#allocation3]  }
  0x11   :  { %108 = dma.done.wait [#allocation3], 64  }
  0x12   :  { %109 = vsyncadd [#allocation3], 4294967232  ;;  %v27_v0 = vlaneseq  ;;  %v113_v1 = vmov 1983009808   ;;  %v25_v7 = vld [vmem:[%s158_s1] sm:$0x3] }
  0x13   :  { %v37_v2 = vunpack.c.l.s4 %v113_v1  ;;  %v24_v12 = vld [vmem:[#allocation2] sm:$0xf]  ;;  %s114_s23 = smov [#allocation5]  }
  0x14   :  { %v28_v3 = vshrl.u32 %v27_v0, 7  ;;  %s52_s0 = sshll.u32 %s114_s23, 4  ;;  %s53_s0 = int_to_ptr.vmem [resolvable:$true] %s52_s0 }
  0x15   :  { %v38_v6 = vunpack.c.0.s8 %v37_v2  ;;  %s86_s24 = scalar_lea.vmem %s53_s0, 64  ;;  %p91_p9 = scmp.lt.s32.totalorder %s53_s0, %s53_s0 }
  0x16   :  { %v29_v4 = vsub.s32 0, %v28_v3  ;;  %v33_v5 = vsub.s32 1, %v28_v3  ;;  %p87_p8 = scmp.ne.s32.totalorder %s53_s0, %s86_s24  ;;  %p92_p10 = scmp.lt.s32.totalorder %s86_s24, %s86_s24 }
  0x17   :  { %v41_v10 = vsub.s32 %v38_v6, %v28_v3 }
  0x18   :  { %v30_v8 = vrot.slane %v25_v7, %v29_v4  ;;  %v34_v9 = vrot.slane %v25_v7, %v33_v5  ;;  %p93_p11 = por %p92_p10, %p91_p9 }
  0x1a   :  { %v35_v11 = vcombine.low %v30_v8, %v34_v9  ;;  %p94_p12 = pnand %p93_p11, %p87_p8 }
  0x1c   :  { %v42_v13 = vrot.slane %v35_v11, %v41_v10 }
  0x1e   :  { %v44_v14 = vadd.f32 %v42_v13, %v24_v12 }
  0x20   :  { %45 = vst [vmem:[#allocation5] sm:$0xf] %v44_v14 }
  0x21   :  { %97 = shalt.err (!%p94_p12)
}
  0x22   :  { %s98_s26 = scalar_lea.hbm %s159_s2, 64 }
  0x23   :  { %p99_p13 = scmp.ne.s32.totalorder %s159_s2, %s98_s26  ;;  %p102_p0 = scmp.lt.u32.totalorder %s98_s26, %s159_s2 }
  0x25   :  { %p104_p1 = pnand %p102_p0, %p99_p13 }
  0x27   :  { %107 = shalt.err (!%p104_p1)
}
  0x28   :  { %55 = dma.vmem_to_hbm [thread:$0]  %s53_s0, 64, %s159_s2, [#allocation4]  }
  0x29   :  { %110 = dma.done.wait [#allocation4], 64  }
  0x2a   :  { %111 = vsyncadd [#allocation4], 4294967232 }
  0x2b   :  { %59 = vsyncpa [#allocation3], 1 }
  0x2c   :  { %60 = vsyncpa [#allocation4], 1 }

</bundles_post_ra>
